<compile_context>
chip_gen: v7x
topology: tpu7x:2x2x1
jax: 0.10.0
libtpu: 0.0.40
codegen_flags: <defaults>
</compile_context>

<pallas_src>
import numpy as np
import jax
import jax.numpy as jnp
from jax import lax
from jax.experimental import pallas as pl
from jax.experimental.pallas import tpu as pltpu


def _make_basic_block_call(N, C, H, W, compute_dtype):
    HW = H * W
    PAD = 128  # >= W+1 halo; 128 keeps the interior scratch write lane-aligned

    def kernel(x_ref, w1_ref, b1_ref, w2_ref, b2_ref, mask_ref, out_ref, xp_ref):
        # x_ref    : (1, C, HW)          f32  current image (also the residual)
        # w1/w2    : (9, C, C)           compute_dtype  per-tap weights, BN scale folded
        # b1/b2    : (C, 1)              f32  folded BN bias
        # mask_ref : (3, 1, HW)          compute_dtype  column-validity mask per kx
        # out_ref  : (1, C, HW)          f32
        # xp_ref   : (C, PAD+HW+PAD)     compute_dtype  zero-padded flat scratch
        x = x_ref[0]  # (C, HW) f32 — single HBM->VMEM read, reused for the residual

        # (Re)zero the halo pads every step: cheap, and stays correct when the
        # "parallel" grid is split across TensorCores (each core has its own scratch).
        zpad = jnp.zeros((C, PAD), compute_dtype)
        xp_ref[:, 0:PAD] = zpad
        xp_ref[:, PAD + HW:PAD + HW + PAD] = zpad

        def conv3x3(w_ref):
            # 9 per-tap matmuls (Cout,Cin)@(Cin,HW), accumulated in f32.
            xp = xp_ref[...]                               # (C, PAD+HW+PAD)
            acc = jnp.zeros((C, HW), jnp.float32)
            for ky in range(3):
                for kx in range(3):
                    off = (ky - 1) * W + (kx - 1)          # static per tap
                    win = xp[:, PAD + off:PAD + off + HW]  # shifted view (C, HW)
                    if kx != 1:                            # cancel row-wrap of +-1 column taps
                        win = win * mask_ref[kx]
                    acc = acc + jnp.dot(w_ref[ky * 3 + kx], win,
                                        preferred_element_type=jnp.float32)
            return acc                                     # (C, HW) f32

        # ---- conv1 + BN1 (bias only; scale folded into w1) + ReLU ----
        xp_ref[:, PAD:PAD + HW] = x.astype(compute_dtype)
        y1 = jnp.maximum(conv3x3(w1_ref) + b1_ref[...], 0.0)

        # ---- conv2 + BN2 + identity residual + ReLU (scratch reused for padded y1) ----
        xp_ref[:, PAD:PAD + HW] = y1.astype(compute_dtype)
        y2 = conv3x3(w2_ref) + b2_ref[...] + x
        out_ref[0] = jnp.maximum(y2, 0.0).astype(out_ref.dtype)

    return pl.pallas_call(
        kernel,
        out_shape=jax.ShapeDtypeStruct((N, C, HW), jnp.float32),
        grid_spec=pltpu.PrefetchScalarGridSpec(
            num_scalar_prefetch=0,
            grid=(N,),
            in_specs=[
                pl.BlockSpec((1, C, HW), lambda n: (n, 0, 0)),      # x (per image)
                pl.BlockSpec((9, C, C), lambda n: (0, 0, 0)),       # w1 (constant)
                pl.BlockSpec((C, 1), lambda n: (0, 0)),             # b1 (constant)
                pl.BlockSpec((9, C, C), lambda n: (0, 0, 0)),       # w2 (constant)
                pl.BlockSpec((C, 1), lambda n: (0, 0)),             # b2 (constant)
                pl.BlockSpec((3, 1, HW), lambda n: (0, 0, 0)),      # column masks
            ],
            out_specs=pl.BlockSpec((1, C, HW), lambda n: (n, 0, 0)),
            scratch_shapes=[pltpu.VMEM((C, PAD + HW + PAD), compute_dtype)],
        ),
        compiler_params=pltpu.CompilerParams(
            dimension_semantics=("parallel",)),
    )


def _fold_conv_bn(w_oihw, bn, eps, compute_dtype):
    """OIHW 3x3 weight + eval-mode BN -> (9, Cout, Cin) tap weights (scale folded)
    and (Cout, 1) bias. Folding done in float64 on the host."""
    w = np.asarray(w_oihw, np.float64)                     # (Co, Ci, 3, 3)
    gamma = np.asarray(bn["gamma"], np.float64)
    beta = np.asarray(bn["beta"], np.float64)
    mean = np.asarray(bn["mean"], np.float64)
    var = np.asarray(bn["var"], np.float64)
    scale = gamma / np.sqrt(var + eps)                     # (Co,)
    bias = beta - mean * scale                             # (Co,)
    wf = w * scale[:, None, None, None]                    # fold BN scale into weights
    wt = np.transpose(wf, (2, 3, 0, 1)).reshape(9, w.shape[0], w.shape[1])
    return (jnp.asarray(wt.astype(np.float32), compute_dtype),
            jnp.asarray(bias.reshape(-1, 1).astype(np.float32), jnp.float32))


def _column_masks(H, W, compute_dtype):
    """0/1 masks (3, 1, H*W) indexed by kx that zero contributions which would
    wrap across image rows in the flattened H*W lane axis."""
    col = np.arange(H * W) % W
    m = np.ones((3, 1, H * W), np.float32)
    m[0, 0, col == 0] = 0.0          # kx=0 (dx=-1): no left neighbour in column 0
    m[2, 0, col == W - 1] = 0.0      # kx=2 (dx=+1): no right neighbour in column W-1
    return jnp.asarray(m, compute_dtype)


def basic_block_pallas(x_nchw, w1, bn1, w2, bn2, *, eps=1e-5, stride=1,
                       downsample=None, compute_dtype=jnp.float32):
    """x_nchw: (N, Cin, H, W) f32. w*: (Cout, Cin, 3, 3) PyTorch OIHW.
    bn*: dict with gamma/beta/mean/var of shape (Cout,) (eval-mode BN)."""
    assert stride == 1 and downsample is None, \
        "TODO(synk): stride>1 / downsample branch not implemented"
    N, Cin, H, W = x_nchw.shape
    Cout = w1.shape[0]
    assert Cin == Cout == w2.shape[0] == w2.shape[1], \
        "identity residual requires inplanes == planes"

    # Flattened NCHW -> (N, C, H*W): contiguous reshape, no transpose passes.
    xflat = jnp.asarray(x_nchw, jnp.float32).reshape(N, Cin, H * W)

    w1t, b1 = _fold_conv_bn(w1, bn1, eps, compute_dtype)
    w2t, b2 = _fold_conv_bn(w2, bn2, eps, compute_dtype)
    masks = _column_masks(H, W, compute_dtype)

    call = _make_basic_block_call(N, Cout, H, W, compute_dtype)
    out = call(xflat, w1t, b1, w2t, b2, masks)
    return out.reshape(N, Cout, H, W)


def basic_block_ref(x_nchw, w1, bn1, w2, bn2, eps=1e-5):
    """Pure-JAX reference matching the PyTorch BasicBlock (eval-mode BN)."""
    x = jnp.transpose(x_nchw, (0, 2, 3, 1))
    dn = ("NHWC", "HWIO", "NHWC")

    def conv_bn(inp, w, bn):
        wk = jnp.transpose(w, (2, 3, 1, 0))  # OIHW -> HWIO
        y = lax.conv_general_dilated(inp, wk, window_strides=(1, 1),
                                     padding="SAME", dimension_numbers=dn)
        scale = bn["gamma"] / jnp.sqrt(bn["var"] + eps)
        return y * scale + (bn["beta"] - bn["mean"] * scale)

    out = jnp.maximum(conv_bn(x, w1, bn1), 0.0)
    out = jnp.maximum(conv_bn(out, w2, bn2) + x, 0.0)
    return jnp.transpose(out, (0, 3, 1, 2))


if __name__ == "__main__":
    key = jax.random.PRNGKey(0)
    N, C, H, W = 2, 4, 16, 16          # inplanes = planes = 4, stride = 1
    ks = jax.random.split(key, 11)

    x = jax.random.normal(ks[0], (N, C, H, W), jnp.float32)

    fan = C * 3 * 3
    std = (2.0 / fan) ** 0.5           # kaiming-style init
    w1 = jax.random.normal(ks[1], (C, C, 3, 3), jnp.float32) * std
    w2 = jax.random.normal(ks[2], (C, C, 3, 3), jnp.float32) * std

    bn1 = dict(
        gamma=jax.random.uniform(ks[3], (C,), jnp.float32, 0.5, 1.5),
        beta=jax.random.normal(ks[4], (C,), jnp.float32) * 0.1,
        mean=jax.random.normal(ks[5], (C,), jnp.float32) * 0.1,
        var=jax.random.uniform(ks[6], (C,), jnp.float32, 0.5, 1.5),
    )
    bn2 = dict(
        gamma=jax.random.uniform(ks[7], (C,), jnp.float32, 0.5, 1.5),
        beta=jax.random.normal(ks[8], (C,), jnp.float32) * 0.1,
        mean=jax.random.normal(ks[9], (C,), jnp.float32) * 0.1,
        var=jax.random.uniform(ks[10], (C,), jnp.float32, 0.5, 1.5),
    )

    ref = jax.block_until_ready(basic_block_ref(x, w1, bn1, w2, bn2))

    # f32 path: exact parity with the f32 reference.
    out_f32 = jax.block_until_ready(basic_block_pallas(x, w1, bn1, w2, bn2))
    assert out_f32.shape == (N, C, H, W)
    err_f32 = float(jnp.max(jnp.abs(out_f32 - ref)))
    assert err_f32 < 1e-4, f"f32 mismatch vs reference: {err_f32}"

    # bf16 operand path (v6e/v7x MXU): f32 accumulation, looser tolerance.
    out_bf16 = jax.block_until_ready(
        basic_block_pallas(x, w1, bn1, w2, bn2, compute_dtype=jnp.bfloat16))
    err_bf16 = float(jnp.max(jnp.abs(out_bf16 - ref)))
    assert err_bf16 < 0.15, f"bf16 mismatch vs reference: {err_bf16}"

    print("KERNEL_OK")
</pallas_src>

<mosaic_0001>
module attributes {stable_mosaic.version = 11 : i64} {
  func.func @kernel(%arg0: i32, %arg1: memref<1x4x256xf32, #tpu.memory_space<vmem>>, %arg2: memref<9x4x4xf32, #tpu.memory_space<vmem>>, %arg3: memref<4x1xf32, #tpu.memory_space<vmem>>, %arg4: memref<9x4x4xf32, #tpu.memory_space<vmem>>, %arg5: memref<4x1xf32, #tpu.memory_space<vmem>>, %arg6: memref<3x1x256xf32, #tpu.memory_space<vmem>>, %arg7: memref<1x4x256xf32, #tpu.memory_space<vmem>>, %arg8: memref<4x512xf32, #tpu.memory_space<vmem>>) attributes {dimension_semantics = [#tpu.dimension_semantics<parallel>], iteration_bounds = array<i64: 2>, scalar_prefetch = 0 : i64, scratch_operands = 1 : i64, tpu.core_type = #tpu.core_type<tc>, window_params = [{transform_indices = @transform_0, window_bounds = array<i64: 1, 4, 256>}, {pipeline_mode = #tpu.pipeline_mode<synchronous>, transform_indices = @transform_1, window_bounds = array<i64: 9, 4, 4>}, {pipeline_mode = #tpu.pipeline_mode<synchronous>, transform_indices = @transform_2, window_bounds = array<i64: 4, 1>}, {pipeline_mode = #tpu.pipeline_mode<synchronous>, transform_indices = @transform_3, window_bounds = array<i64: 9, 4, 4>}, {pipeline_mode = #tpu.pipeline_mode<synchronous>, transform_indices = @transform_4, window_bounds = array<i64: 4, 1>}, {pipeline_mode = #tpu.pipeline_mode<synchronous>, transform_indices = @transform_5, window_bounds = array<i64: 3, 1, 256>}, {transform_indices = @transform_6, window_bounds = array<i64: 1, 4, 256>}]} {
    %c0 = arith.constant 0 : index
    %c0_0 = arith.constant 0 : index
    %c0_1 = arith.constant 0 : index
    %0 = vector.load %arg1[%c0, %c0_0, %c0_1] : memref<1x4x256xf32, #tpu.memory_space<vmem>>, vector<1x4x256xf32>
    %1 = vector.shape_cast %0 : vector<1x4x256xf32> to vector<4x256xf32>
    %cst = arith.constant 0.000000e+00 : f32
    %2 = vector.broadcast %cst : f32 to vector<4x128xf32>
    %c0_2 = arith.constant 0 : index
    %c0_3 = arith.constant 0 : index
    %3 = vector.load %arg8[%c0_2, %c0_3] : memref<4x512xf32, #tpu.memory_space<vmem>>, vector<4x128xf32>
    tpu.vector_store %arg8[%c0_2, %c0_3], %2 {strides = array<i32>} : memref<4x512xf32, #tpu.memory_space<vmem>>, vector<4x128xf32>,
    %c0_4 = arith.constant 0 : index
    %c384 = arith.constant 384 : index
    %4 = vector.load %arg8[%c0_4, %c384] : memref<4x512xf32, #tpu.memory_space<vmem>>, vector<4x128xf32>
    tpu.vector_store %arg8[%c0_4, %c384], %2 {strides = array<i32>} : memref<4x512xf32, #tpu.memory_space<vmem>>, vector<4x128xf32>,
    %c0_5 = arith.constant 0 : index
    %c128 = arith.constant 128 : index
    %5 = vector.load %arg8[%c0_5, %c128] : memref<4x512xf32, #tpu.memory_space<vmem>>, vector<4x256xf32>
    tpu.vector_store %arg8[%c0_5, %c128], %1 {strides = array<i32>} : memref<4x512xf32, #tpu.memory_space<vmem>>, vector<4x256xf32>,
    %c0_6 = arith.constant 0 : index
    %c0_7 = arith.constant 0 : index
    %6 = vector.load %arg8[%c0_6, %c0_7] : memref<4x512xf32, #tpu.memory_space<vmem>>, vector<4x512xf32>
    %cst_8 = arith.constant 0.000000e+00 : f32
    %7 = vector.broadcast %cst_8 : f32 to vector<4x256xf32>
    %8 = vector.extract_strided_slice %6 {offsets = [0, 111], sizes = [4, 256], strides = [1, 1]} : vector<4x512xf32> to vector<4x256xf32>
    %c0_9 = arith.constant 0 : index
    %c0_10 = arith.constant 0 : index
    %c0_11 = arith.constant 0 : index
    %9 = vector.load %arg6[%c0_9, %c0_10, %c0_11] : memref<3x1x256xf32, #tpu.memory_space<vmem>>, vector<1x1x256xf32>
    %10 = vector.shape_cast %9 : vector<1x1x256xf32> to vector<1x256xf32>
    %11 = vector.broadcast %10 : vector<1x256xf32> to vector<4x256xf32>
    %12 = arith.mulf %8, %11 : vector<4x256xf32>
    %c0_12 = arith.constant 0 : index
    %c0_13 = arith.constant 0 : index
    %c0_14 = arith.constant 0 : index
    %13 = vector.load %arg2[%c0_12, %c0_13, %c0_14] : memref<9x4x4xf32, #tpu.memory_space<vmem>>, vector<1x4x4xf32>
    %14 = vector.shape_cast %13 : vector<1x4x4xf32> to vector<4x4xf32>
    %cst_15 = arith.constant dense<0.000000e+00> : vector<4x256xf32>
    %15 = tpu.matmul %14, %12, %cst_15 {dimension_numbers = #tpu.dot_dimension_numbers<[1], [0], [0], [1], [0, 0, 1, 1], [], []>} : vector<4x4xf32>, vector<4x256xf32>, vector<4x256xf32> -> vector<4x256xf32>
    %16 = arith.addf %7, %15 : vector<4x256xf32>
    %17 = vector.extract_strided_slice %6 {offsets = [0, 112], sizes = [4, 256], strides = [1, 1]} : vector<4x512xf32> to vector<4x256xf32>
    %c1 = arith.constant 1 : index
    %c0_16 = arith.constant 0 : index
    %c0_17 = arith.constant 0 : index
    %18 = vector.load %arg2[%c1, %c0_16, %c0_17] : memref<9x4x4xf32, #tpu.memory_space<vmem>>, vector<1x4x4xf32>
    %19 = vector.shape_cast %18 : vector<1x4x4xf32> to vector<4x4xf32>
    %cst_18 = arith.constant dense<0.000000e+00> : vector<4x256xf32>
    %20 = tpu.matmul %19, %17, %cst_18 {dimension_numbers = #tpu.dot_dimension_numbers<[1], [0], [0], [1], [0, 0, 1, 1], [], []>} : vector<4x4xf32>, vector<4x256xf32>, vector<4x256xf32> -> vector<4x256xf32>
    %21 = arith.addf %16, %20 : vector<4x256xf32>
    %22 = vector.extract_strided_slice %6 {offsets = [0, 113], sizes = [4, 256], strides = [1, 1]} : vector<4x512xf32> to vector<4x256xf32>
    %c2 = arith.constant 2 : index
    %c0_19 = arith.constant 0 : index
    %c0_20 = arith.constant 0 : index
    %23 = vector.load %arg6[%c2, %c0_19, %c0_20] : memref<3x1x256xf32, #tpu.memory_space<vmem>>, vector<1x1x256xf32>
    %24 = vector.shape_cast %23 : vector<1x1x256xf32> to vector<1x256xf32>
    %25 = vector.broadcast %24 : vector<1x256xf32> to vector<4x256xf32>
    %26 = arith.mulf %22, %25 : vector<4x256xf32>
    %c2_21 = arith.constant 2 : index
    %c0_22 = arith.constant 0 : index
    %c0_23 = arith.constant 0 : index
    %27 = vector.load %arg2[%c2_21, %c0_22, %c0_23] : memref<9x4x4xf32, #tpu.memory_space<vmem>>, vector<1x4x4xf32>
    %28 = vector.shape_cast %27 : vector<1x4x4xf32> to vector<4x4xf32>
    %cst_24 = arith.constant dense<0.000000e+00> : vector<4x256xf32>
    %29 = tpu.matmul %28, %26, %cst_24 {dimension_numbers = #tpu.dot_dimension_numbers<[1], [0], [0], [1], [0, 0, 1, 1], [], []>} : vector<4x4xf32>, vector<4x256xf32>, vector<4x256xf32> -> vector<4x256xf32>
    %30 = arith.addf %21, %29 : vector<4x256xf32>
    %31 = vector.extract_strided_slice %6 {offsets = [0, 127], sizes = [4, 256], strides = [1, 1]} : vector<4x512xf32> to vector<4x256xf32>
    %c0_25 = arith.constant 0 : index
    %c0_26 = arith.constant 0 : index
    %c0_27 = arith.constant 0 : index
    %32 = vector.load %arg6[%c0_25, %c0_26, %c0_27] : memref<3x1x256xf32, #tpu.memory_space<vmem>>, vector<1x1x256xf32>
    %33 = vector.shape_cast %32 : vector<1x1x256xf32> to vector<1x256xf32>
    %34 = vector.broadcast %33 : vector<1x256xf32> to vector<4x256xf32>
    %35 = arith.mulf %31, %34 : vector<4x256xf32>
    %c3 = arith.constant 3 : index
    %c0_28 = arith.constant 0 : index
    %c0_29 = arith.constant 0 : index
    %36 = vector.load %arg2[%c3, %c0_28, %c0_29] : memref<9x4x4xf32, #tpu.memory_space<vmem>>, vector<1x4x4xf32>
    %37 = vector.shape_cast %36 : vector<1x4x4xf32> to vector<4x4xf32>
    %cst_30 = arith.constant dense<0.000000e+00> : vector<4x256xf32>
    %38 = tpu.matmul %37, %35, %cst_30 {dimension_numbers = #tpu.dot_dimension_numbers<[1], [0], [0], [1], [0, 0, 1, 1], [], []>} : vector<4x4xf32>, vector<4x256xf32>, vector<4x256xf32> -> vector<4x256xf32>
    %39 = arith.addf %30, %38 : vector<4x256xf32>
    %40 = vector.extract_strided_slice %6 {offsets = [0, 128], sizes = [4, 256], strides = [1, 1]} : vector<4x512xf32> to vector<4x256xf32>
    %c4 = arith.constant 4 : index
    %c0_31 = arith.constant 0 : index
    %c0_32 = arith.constant 0 : index
    %41 = vector.load %arg2[%c4, %c0_31, %c0_32] : memref<9x4x4xf32, #tpu.memory_space<vmem>>, vector<1x4x4xf32>
    %42 = vector.shape_cast %41 : vector<1x4x4xf32> to vector<4x4xf32>
    %cst_33 = arith.constant dense<0.000000e+00> : vector<4x256xf32>
    %43 = tpu.matmul %42, %40, %cst_33 {dimension_numbers = #tpu.dot_dimension_numbers<[1], [0], [0], [1], [0, 0, 1, 1], [], []>} : vector<4x4xf32>, vector<4x256xf32>, vector<4x256xf32> -> vector<4x256xf32>
    %44 = arith.addf %39, %43 : vector<4x256xf32>
    %45 = vector.extract_strided_slice %6 {offsets = [0, 129], sizes = [4, 256], strides = [1, 1]} : vector<4x512xf32> to vector<4x256xf32>
    %c2_34 = arith.constant 2 : index
    %c0_35 = arith.constant 0 : index
    %c0_36 = arith.constant 0 : index
    %46 = vector.load %arg6[%c2_34, %c0_35, %c0_36] : memref<3x1x256xf32, #tpu.memory_space<vmem>>, vector<1x1x256xf32>
    %47 = vector.shape_cast %46 : vector<1x1x256xf32> to vector<1x256xf32>
    %48 = vector.broadcast %47 : vector<1x256xf32> to vector<4x256xf32>
    %49 = arith.mulf %45, %48 : vector<4x256xf32>
    %c5 = arith.constant 5 : index
    %c0_37 = arith.constant 0 : index
    %c0_38 = arith.constant 0 : index
    %50 = vector.load %arg2[%c5, %c0_37, %c0_38] : memref<9x4x4xf32, #tpu.memory_space<vmem>>, vector<1x4x4xf32>
    %51 = vector.shape_cast %50 : vector<1x4x4xf32> to vector<4x4xf32>
    %cst_39 = arith.constant dense<0.000000e+00> : vector<4x256xf32>
    %52 = tpu.matmul %51, %49, %cst_39 {dimension_numbers = #tpu.dot_dimension_numbers<[1], [0], [0], [1], [0, 0, 1, 1], [], []>} : vector<4x4xf32>, vector<4x256xf32>, vector<4x256xf32> -> vector<4x256xf32>
    %53 = arith.addf %44, %52 : vector<4x256xf32>
    %54 = vector.extract_strided_slice %6 {offsets = [0, 143], sizes = [4, 256], strides = [1, 1]} : vector<4x512xf32> to vector<4x256xf32>
    %c0_40 = arith.constant 0 : index
    %c0_41 = arith.constant 0 : index
    %c0_42 = arith.constant 0 : index
    %55 = vector.load %arg6[%c0_40, %c0_41, %c0_42] : memref<3x1x256xf32, #tpu.memory_space<vmem>>, vector<1x1x256xf32>
    %56 = vector.shape_cast %55 : vector<1x1x256xf32> to vector<1x256xf32>
    %57 = vector.broadcast %56 : vector<1x256xf32> to vector<4x256xf32>
    %58 = arith.mulf %54, %57 : vector<4x256xf32>
    %c6 = arith.constant 6 : index
    %c0_43 = arith.constant 0 : index
    %c0_44 = arith.constant 0 : index
    %59 = vector.load %arg2[%c6, %c0_43, %c0_44] : memref<9x4x4xf32, #tpu.memory_space<vmem>>, vector<1x4x4xf32>
    %60 = vector.shape_cast %59 : vector<1x4x4xf32> to vector<4x4xf32>
    %cst_45 = arith.constant dense<0.000000e+00> : vector<4x256xf32>
    %61 = tpu.matmul %60, %58, %cst_45 {dimension_numbers = #tpu.dot_dimension_numbers<[1], [0], [0], [1], [0, 0, 1, 1], [], []>} : vector<4x4xf32>, vector<4x256xf32>, vector<4x256xf32> -> vector<4x256xf32>
    %62 = arith.addf %53, %61 : vector<4x256xf32>
    %63 = vector.extract_strided_slice %6 {offsets = [0, 144], sizes = [4, 256], strides = [1, 1]} : vector<4x512xf32> to vector<4x256xf32>
    %c7 = arith.constant 7 : index
    %c0_46 = arith.constant 0 : index
    %c0_47 = arith.constant 0 : index
    %64 = vector.load %arg2[%c7, %c0_46, %c0_47] : memref<9x4x4xf32, #tpu.memory_space<vmem>>, vector<1x4x4xf32>
    %65 = vector.shape_cast %64 : vector<1x4x4xf32> to vector<4x4xf32>
    %cst_48 = arith.constant dense<0.000000e+00> : vector<4x256xf32>
    %66 = tpu.matmul %65, %63, %cst_48 {dimension_numbers = #tpu.dot_dimension_numbers<[1], [0], [0], [1], [0, 0, 1, 1], [], []>} : vector<4x4xf32>, vector<4x256xf32>, vector<4x256xf32> -> vector<4x256xf32>
    %67 = arith.addf %62, %66 : vector<4x256xf32>
    %68 = vector.extract_strided_slice %6 {offsets = [0, 145], sizes = [4, 256], strides = [1, 1]} : vector<4x512xf32> to vector<4x256xf32>
    %c2_49 = arith.constant 2 : index
    %c0_50 = arith.constant 0 : index
    %c0_51 = arith.constant 0 : index
    %69 = vector.load %arg6[%c2_49, %c0_50, %c0_51] : memref<3x1x256xf32, #tpu.memory_space<vmem>>, vector<1x1x256xf32>
    %70 = vector.shape_cast %69 : vector<1x1x256xf32> to vector<1x256xf32>
    %71 = vector.broadcast %70 : vector<1x256xf32> to vector<4x256xf32>
    %72 = arith.mulf %68, %71 : vector<4x256xf32>
    %c8 = arith.constant 8 : index
    %c0_52 = arith.constant 0 : index
    %c0_53 = arith.constant 0 : index
    %73 = vector.load %arg2[%c8, %c0_52, %c0_53] : memref<9x4x4xf32, #tpu.memory_space<vmem>>, vector<1x4x4xf32>
    %74 = vector.shape_cast %73 : vector<1x4x4xf32> to vector<4x4xf32>
    %cst_54 = arith.constant dense<0.000000e+00> : vector<4x256xf32>
    %75 = tpu.matmul %74, %72, %cst_54 {dimension_numbers = #tpu.dot_dimension_numbers<[1], [0], [0], [1], [0, 0, 1, 1], [], []>} : vector<4x4xf32>, vector<4x256xf32>, vector<4x256xf32> -> vector<4x256xf32>
    %76 = arith.addf %67, %75 : vector<4x256xf32>
    %c0_55 = arith.constant 0 : index
    %c0_56 = arith.constant 0 : index
    %77 = vector.load %arg3[%c0_55, %c0_56] : memref<4x1xf32, #tpu.memory_space<vmem>>, vector<4x1xf32>
    %78 = vector.broadcast %77 : vector<4x1xf32> to vector<4x256xf32>
    %79 = arith.addf %76, %78 : vector<4x256xf32>
    %cst_57 = arith.constant 0.000000e+00 : f32
    %80 = vector.broadcast %cst_57 : f32 to vector<4x256xf32>
    %81 = arith.maximumf %79, %80 : vector<4x256xf32>
    %c0_58 = arith.constant 0 : index
    %c128_59 = arith.constant 128 : index
    %82 = vector.load %arg8[%c0_58, %c128_59] : memref<4x512xf32, #tpu.memory_space<vmem>>, vector<4x256xf32>
    tpu.vector_store %arg8[%c0_58, %c128_59], %81 {strides = array<i32>} : memref<4x512xf32, #tpu.memory_space<vmem>>, vector<4x256xf32>,
    %c0_60 = arith.constant 0 : index
    %c0_61 = arith.constant 0 : index
    %83 = vector.load %arg8[%c0_60, %c0_61] : memref<4x512xf32, #tpu.memory_space<vmem>>, vector<4x512xf32>
    %cst_62 = arith.constant 0.000000e+00 : f32
    %84 = vector.broadcast %cst_62 : f32 to vector<4x256xf32>
    %85 = vector.extract_strided_slice %83 {offsets = [0, 111], sizes = [4, 256], strides = [1, 1]} : vector<4x512xf32> to vector<4x256xf32>
    %c0_63 = arith.constant 0 : index
    %c0_64 = arith.constant 0 : index
    %c0_65 = arith.constant 0 : index
    %86 = vector.load %arg6[%c0_63, %c0_64, %c0_65] : memref<3x1x256xf32, #tpu.memory_space<vmem>>, vector<1x1x256xf32>
    %87 = vector.shape_cast %86 : vector<1x1x256xf32> to vector<1x256xf32>
    %88 = vector.broadcast %87 : vector<1x256xf32> to vector<4x256xf32>
    %89 = arith.mulf %85, %88 : vector<4x256xf32>
    %c0_66 = arith.constant 0 : index
    %c0_67 = arith.constant 0 : index
    %c0_68 = arith.constant 0 : index
    %90 = vector.load %arg4[%c0_66, %c0_67, %c0_68] : memref<9x4x4xf32, #tpu.memory_space<vmem>>, vector<1x4x4xf32>
    %91 = vector.shape_cast %90 : vector<1x4x4xf32> to vector<4x4xf32>
    %cst_69 = arith.constant dense<0.000000e+00> : vector<4x256xf32>
    %92 = tpu.matmul %91, %89, %cst_69 {dimension_numbers = #tpu.dot_dimension_numbers<[1], [0], [0], [1], [0, 0, 1, 1], [], []>} : vector<4x4xf32>, vector<4x256xf32>, vector<4x256xf32> -> vector<4x256xf32>
    %93 = arith.addf %84, %92 : vector<4x256xf32>
    %94 = vector.extract_strided_slice %83 {offsets = [0, 112], sizes = [4, 256], strides = [1, 1]} : vector<4x512xf32> to vector<4x256xf32>
    %c1_70 = arith.constant 1 : index
    %c0_71 = arith.constant 0 : index
    %c0_72 = arith.constant 0 : index
    %95 = vector.load %arg4[%c1_70, %c0_71, %c0_72] : memref<9x4x4xf32, #tpu.memory_space<vmem>>, vector<1x4x4xf32>
    %96 = vector.shape_cast %95 : vector<1x4x4xf32> to vector<4x4xf32>
    %cst_73 = arith.constant dense<0.000000e+00> : vector<4x256xf32>
    %97 = tpu.matmul %96, %94, %cst_73 {dimension_numbers = #tpu.dot_dimension_numbers<[1], [0], [0], [1], [0, 0, 1, 1], [], []>} : vector<4x4xf32>, vector<4x256xf32>, vector<4x256xf32> -> vector<4x256xf32>
    %98 = arith.addf %93, %97 : vector<4x256xf32>
    %99 = vector.extract_strided_slice %83 {offsets = [0, 113], sizes = [4, 256], strides = [1, 1]} : vector<4x512xf32> to vector<4x256xf32>
    %c2_74 = arith.constant 2 : index
    %c0_75 = arith.constant 0 : index
    %c0_76 = arith.constant 0 : index
    %100 = vector.load %arg6[%c2_74, %c0_75, %c0_76] : memref<3x1x256xf32, #tpu.memory_space<vmem>>, vector<1x1x256xf32>
    %101 = vector.shape_cast %100 : vector<1x1x256xf32> to vector<1x256xf32>
    %102 = vector.broadcast %101 : vector<1x256xf32> to vector<4x256xf32>
    %103 = arith.mulf %99, %102 : vector<4x256xf32>
    %c2_77 = arith.constant 2 : index
    %c0_78 = arith.constant 0 : index
    %c0_79 = arith.constant 0 : index
    %104 = vector.load %arg4[%c2_77, %c0_78, %c0_79] : memref<9x4x4xf32, #tpu.memory_space<vmem>>, vector<1x4x4xf32>
    %105 = vector.shape_cast %104 : vector<1x4x4xf32> to vector<4x4xf32>
    %cst_80 = arith.constant dense<0.000000e+00> : vector<4x256xf32>
    %106 = tpu.matmul %105, %103, %cst_80 {dimension_numbers = #tpu.dot_dimension_numbers<[1], [0], [0], [1], [0, 0, 1, 1], [], []>} : vector<4x4xf32>, vector<4x256xf32>, vector<4x256xf32> -> vector<4x256xf32>
    %107 = arith.addf %98, %106 : vector<4x256xf32>
    %108 = vector.extract_strided_slice %83 {offsets = [0, 127], sizes = [4, 256], strides = [1, 1]} : vector<4x512xf32> to vector<4x256xf32>
    %c0_81 = arith.constant 0 : index
    %c0_82 = arith.constant 0 : index
    %c0_83 = arith.constant 0 : index
    %109 = vector.load %arg6[%c0_81, %c0_82, %c0_83] : memref<3x1x256xf32, #tpu.memory_space<vmem>>, vector<1x1x256xf32>
    %110 = vector.shape_cast %109 : vector<1x1x256xf32> to vector<1x256xf32>
    %111 = vector.broadcast %110 : vector<1x256xf32> to vector<4x256xf32>
    %112 = arith.mulf %108, %111 : vector<4x256xf32>
    %c3_84 = arith.constant 3 : index
    %c0_85 = arith.constant 0 : index
    %c0_86 = arith.constant 0 : index
    %113 = vector.load %arg4[%c3_84, %c0_85, %c0_86] : memref<9x4x4xf32, #tpu.memory_space<vmem>>, vector<1x4x4xf32>
    %114 = vector.shape_cast %113 : vector<1x4x4xf32> to vector<4x4xf32>
    %cst_87 = arith.constant dense<0.000000e+00> : vector<4x256xf32>
    %115 = tpu.matmul %114, %112, %cst_87 {dimension_numbers = #tpu.dot_dimension_numbers<[1], [0], [0], [1], [0, 0, 1, 1], [], []>} : vector<4x4xf32>, vector<4x256xf32>, vector<4x256xf32> -> vector<4x256xf32>
    %116 = arith.addf %107, %115 : vector<4x256xf32>
    %117 = vector.extract_strided_slice %83 {offsets = [0, 128], sizes = [4, 256], strides = [1, 1]} : vector<4x512xf32> to vector<4x256xf32>
    %c4_88 = arith.constant 4 : index
    %c0_89 = arith.constant 0 : index
    %c0_90 = arith.constant 0 : index
    %118 = vector.load %arg4[%c4_88, %c0_89, %c0_90] : memref<9x4x4xf32, #tpu.memory_space<vmem>>, vector<1x4x4xf32>
    %119 = vector.shape_cast %118 : vector<1x4x4xf32> to vector<4x4xf32>
    %cst_91 = arith.constant dense<0.000000e+00> : vector<4x256xf32>
    %120 = tpu.matmul %119, %117, %cst_91 {dimension_numbers = #tpu.dot_dimension_numbers<[1], [0], [0], [1], [0, 0, 1, 1], [], []>} : vector<4x4xf32>, vector<4x256xf32>, vector<4x256xf32> -> vector<4x256xf32>
    %121 = arith.addf %116, %120 : vector<4x256xf32>
    %122 = vector.extract_strided_slice %83 {offsets = [0, 129], sizes = [4, 256], strides = [1, 1]} : vector<4x512xf32> to vector<4x256xf32>
    %c2_92 = arith.constant 2 : index
    %c0_93 = arith.constant 0 : index
    %c0_94 = arith.constant 0 : index
    %123 = vector.load %arg6[%c2_92, %c0_93, %c0_94] : memref<3x1x256xf32, #tpu.memory_space<vmem>>, vector<1x1x256xf32>
    %124 = vector.shape_cast %123 : vector<1x1x256xf32> to vector<1x256xf32>
    %125 = vector.broadcast %124 : vector<1x256xf32> to vector<4x256xf32>
    %126 = arith.mulf %122, %125 : vector<4x256xf32>
    %c5_95 = arith.constant 5 : index
    %c0_96 = arith.constant 0 : index
    %c0_97 = arith.constant 0 : index
    %127 = vector.load %arg4[%c5_95, %c0_96, %c0_97] : memref<9x4x4xf32, #tpu.memory_space<vmem>>, vector<1x4x4xf32>
    %128 = vector.shape_cast %127 : vector<1x4x4xf32> to vector<4x4xf32>
    %cst_98 = arith.constant dense<0.000000e+00> : vector<4x256xf32>
    %129 = tpu.matmul %128, %126, %cst_98 {dimension_numbers = #tpu.dot_dimension_numbers<[1], [0], [0], [1], [0, 0, 1, 1], [], []>} : vector<4x4xf32>, vector<4x256xf32>, vector<4x256xf32> -> vector<4x256xf32>
    %130 = arith.addf %121, %129 : vector<4x256xf32>
    %131 = vector.extract_strided_slice %83 {offsets = [0, 143], sizes = [4, 256], strides = [1, 1]} : vector<4x512xf32> to vector<4x256xf32>
    %c0_99 = arith.constant 0 : index
    %c0_100 = arith.constant 0 : index
    %c0_101 = arith.constant 0 : index
    %132 = vector.load %arg6[%c0_99, %c0_100, %c0_101] : memref<3x1x256xf32, #tpu.memory_space<vmem>>, vector<1x1x256xf32>
    %133 = vector.shape_cast %132 : vector<1x1x256xf32> to vector<1x256xf32>
    %134 = vector.broadcast %133 : vector<1x256xf32> to vector<4x256xf32>
    %135 = arith.mulf %131, %134 : vector<4x256xf32>
    %c6_102 = arith.constant 6 : index
    %c0_103 = arith.constant 0 : index
    %c0_104 = arith.constant 0 : index
    %136 = vector.load %arg4[%c6_102, %c0_103, %c0_104] : memref<9x4x4xf32, #tpu.memory_space<vmem>>, vector<1x4x4xf32>
    %137 = vector.shape_cast %136 : vector<1x4x4xf32> to vector<4x4xf32>
    %cst_105 = arith.constant dense<0.000000e+00> : vector<4x256xf32>
    %138 = tpu.matmul %137, %135, %cst_105 {dimension_numbers = #tpu.dot_dimension_numbers<[1], [0], [0], [1], [0, 0, 1, 1], [], []>} : vector<4x4xf32>, vector<4x256xf32>, vector<4x256xf32> -> vector<4x256xf32>
    %139 = arith.addf %130, %138 : vector<4x256xf32>
    %140 = vector.extract_strided_slice %83 {offsets = [0, 144], sizes = [4, 256], strides = [1, 1]} : vector<4x512xf32> to vector<4x256xf32>
    %c7_106 = arith.constant 7 : index
    %c0_107 = arith.constant 0 : index
    %c0_108 = arith.constant 0 : index
    %141 = vector.load %arg4[%c7_106, %c0_107, %c0_108] : memref<9x4x4xf32, #tpu.memory_space<vmem>>, vector<1x4x4xf32>
    %142 = vector.shape_cast %141 : vector<1x4x4xf32> to vector<4x4xf32>
    %cst_109 = arith.constant dense<0.000000e+00> : vector<4x256xf32>
    %143 = tpu.matmul %142, %140, %cst_109 {dimension_numbers = #tpu.dot_dimension_numbers<[1], [0], [0], [1], [0, 0, 1, 1], [], []>} : vector<4x4xf32>, vector<4x256xf32>, vector<4x256xf32> -> vector<4x256xf32>
    %144 = arith.addf %139, %143 : vector<4x256xf32>
    %145 = vector.extract_strided_slice %83 {offsets = [0, 145], sizes = [4, 256], strides = [1, 1]} : vector<4x512xf32> to vector<4x256xf32>
    %c2_110 = arith.constant 2 : index
    %c0_111 = arith.constant 0 : index
    %c0_112 = arith.constant 0 : index
    %146 = vector.load %arg6[%c2_110, %c0_111, %c0_112] : memref<3x1x256xf32, #tpu.memory_space<vmem>>, vector<1x1x256xf32>
    %147 = vector.shape_cast %146 : vector<1x1x256xf32> to vector<1x256xf32>
    %148 = vector.broadcast %147 : vector<1x256xf32> to vector<4x256xf32>
    %149 = arith.mulf %145, %148 : vector<4x256xf32>
    %c8_113 = arith.constant 8 : index
    %c0_114 = arith.constant 0 : index
    %c0_115 = arith.constant 0 : index
    %150 = vector.load %arg4[%c8_113, %c0_114, %c0_115] : memref<9x4x4xf32, #tpu.memory_space<vmem>>, vector<1x4x4xf32>
    %151 = vector.shape_cast %150 : vector<1x4x4xf32> to vector<4x4xf32>
    %cst_116 = arith.constant dense<0.000000e+00> : vector<4x256xf32>
    %152 = tpu.matmul %151, %149, %cst_116 {dimension_numbers = #tpu.dot_dimension_numbers<[1], [0], [0], [1], [0, 0, 1, 1], [], []>} : vector<4x4xf32>, vector<4x256xf32>, vector<4x256xf32> -> vector<4x256xf32>
    %153 = arith.addf %144, %152 : vector<4x256xf32>
    %c0_117 = arith.constant 0 : index
    %c0_118 = arith.constant 0 : index
    %154 = vector.load %arg5[%c0_117, %c0_118] : memref<4x1xf32, #tpu.memory_space<vmem>>, vector<4x1xf32>
    %155 = vector.broadcast %154 : vector<4x1xf32> to vector<4x256xf32>
    %156 = arith.addf %153, %155 : vector<4x256xf32>
    %157 = arith.addf %156, %1 : vector<4x256xf32>
    %cst_119 = arith.constant 0.000000e+00 : f32
    %158 = vector.broadcast %cst_119 : f32 to vector<4x256xf32>
    %159 = arith.maximumf %157, %158 : vector<4x256xf32>
    %c0_120 = arith.constant 0 : index
    %c0_121 = arith.constant 0 : index
    %c0_122 = arith.constant 0 : index
    %160 = vector.load %arg7[%c0_120, %c0_121, %c0_122] : memref<1x4x256xf32, #tpu.memory_space<vmem>>, vector<1x4x256xf32>
    %161 = vector.shape_cast %160 : vector<1x4x256xf32> to vector<4x256xf32>
    %162 = vector.shape_cast %159 : vector<4x256xf32> to vector<1x4x256xf32>
    tpu.vector_store %arg7[%c0_120, %c0_121, %c0_122], %162 {strides = array<i32>} : memref<1x4x256xf32, #tpu.memory_space<vmem>>, vector<1x4x256xf32>,
    return
  }
  func.func @transform_0(%arg0: i32) -> (i32, i32, i32) {
    %c0_i32 = arith.constant 0 : i32
    %c0_i32_0 = arith.constant 0 : i32
    %c0_i32_1 = arith.constant 0 : i32
    return %arg0, %c0_i32, %c0_i32_0 : i32, i32, i32
  }
  func.func @transform_1(%arg0: i32) -> (i32, i32, i32) {
    %c0_i32 = arith.constant 0 : i32
    %c0_i32_0 = arith.constant 0 : i32
    %c0_i32_1 = arith.constant 0 : i32
    %c0_i32_2 = arith.constant 0 : i32
    return %c0_i32, %c0_i32_0, %c0_i32_1 : i32, i32, i32
  }
  func.func @transform_2(%arg0: i32) -> (i32, i32) {
    %c0_i32 = arith.constant 0 : i32
    %c0_i32_0 = arith.constant 0 : i32
    %c0_i32_1 = arith.constant 0 : i32
    return %c0_i32, %c0_i32_0 : i32, i32
  }
  func.func @transform_3(%arg0: i32) -> (i32, i32, i32) {
    %c0_i32 = arith.constant 0 : i32
    %c0_i32_0 = arith.constant 0 : i32
    %c0_i32_1 = arith.constant 0 : i32
    %c0_i32_2 = arith.constant 0 : i32
    return %c0_i32, %c0_i32_0, %c0_i32_1 : i32, i32, i32
  }
  func.func @transform_4(%arg0: i32) -> (i32, i32) {
    %c0_i32 = arith.constant 0 : i32
    %c0_i32_0 = arith.constant 0 : i32
    %c0_i32_1 = arith.constant 0 : i32
    return %c0_i32, %c0_i32_0 : i32, i32
  }
  func.func @transform_5(%arg0: i32) -> (i32, i32, i32) {
    %c0_i32 = arith.constant 0 : i32
    %c0_i32_0 = arith.constant 0 : i32
    %c0_i32_1 = arith.constant 0 : i32
    %c0_i32_2 = arith.constant 0 : i32
    return %c0_i32, %c0_i32_0, %c0_i32_1 : i32, i32, i32
  }
  func.func @transform_6(%arg0: i32) -> (i32, i32, i32) {
    %c0_i32 = arith.constant 0 : i32
    %c0_i32_0 = arith.constant 0 : i32
    %c0_i32_1 = arith.constant 0 : i32
    return %arg0, %c0_i32, %c0_i32_0 : i32, i32, i32
  }
}

</mosaic_0001>

<bundles_post_ra>
// kernel: tpu_custom_call.1
= control target key start
LH: loop header
LB: loop body
LE: loop exit
PB: predicated region body
PF: predicated region fallthrough
CT: control target
= control target key end

     0   :  { %11 = vsyncpa [#allocation4], 0  ;;  %s2807_s0 = inlined_call_operand.vmem [shape: f32[2,4,256], index: 0, kind: input, shape index: {}]   ;;  %s2808_s1 = inlined_call_operand.vmem [shape: f32[9,4,4], index: 1, kind: input, shape index: {}]   ;;  %s2809_s2 = inlined_call_operand.vmem [shape: f32[4,1], index: 2, kind: input, shape index: {}]   ;;  %s2810_s3 = inlined_call_operand.vmem [shape: f32[9,4,4], index: 3, kind: input, shape index: {}]   ;;  %s2811_s4 = inlined_call_operand.vmem [shape: f32[4,1], index: 4, kind: input, shape index: {}]   ;;  %s2812_s5 = inlined_call_operand.vmem [shape: f32[3,1,256], index: 5, kind: input, shape index: {}]   ;;  %s2813_s6 = inlined_call_operand.hbm [shape: f32[2,4,256], index: 6, kind: output, shape index: {}]  }
   0x1   :  { %13 = vsyncpa [#allocation4 + $0x1], 0  ;;  %s2401_s21 = smov 0   ;;  %s2403_s22 = smov 0  }
   0x2   :  { %s2405_s23 = smov 0   ;;  %s2407_s24 = smov 0  }
   0x3 LB: > { %s2422_s25 = sadd.s32 4294967295, %s2353_s24   ;;  %s2118_s26 = sadd.s32 4294967294, %s2353_s24   ;;  %s2353_s24 = sphi %s2407_s24, %s2819_s24   ;;  %s2349_s23 = sphi %s2405_s23, %s2818_s23   ;;  %s2345_s22 = sphi %s2403_s22, %s2817_s22   ;;  %s2341_s21 = sphi %s2401_s21, %s2816_s21  }
   0x4   : > { %s2426_s27 = sadd.s32 1, %s2353_s24   ;;  %s157_s28 = sadd.s32 1, %s2349_s23 }
   0x5   : > { %s154_s29 = ssub.s32 %s2353_s24, %s2426_s27  ;;  %p167_p0 = scmp.ne.s32.totalorder %s2349_s23, %s2345_s22 }
   0x6   : > { %p155_p1 = scmp.eq.s32.totalorder %s154_s29, 0  ;;  %p168_p2 = scmp.eq.s32.totalorder %s2422_s25, 1 }
   0x7   : > { %p173_p3 = scmp.ne.s32.totalorder %s2345_s22, %s2341_s21  ;;  %p174_p4 = scmp.eq.s32.totalorder %s2118_s26, 1 }
   0x8   : > { %s2437_s30 = scalar_select %p155_p1, %s2349_s23, %s157_s28  }
   0x9   : > { %p2439_p5 = por %p168_p2, %p167_p0  ;;  %p2443_p6 = por %p174_p4, %p173_p3 }
   0xa   : > { %p2121_p7 = scmp.ge.s32.totalorder %s2353_s24, 1  ;;  %p215_p8 = scmp.lt.s32.totalorder %s2353_s24, 3 }
   0xc   : > { %p216_p9 = pnand %p2121_p7, %p215_p8 }
   0xd   : > { %v258_v0 = vlaneseq (!%p216_p9)  ;;  %p245_p10 = scmp.lt.s32.totalorder (!%p216_p9), %s2422_s25, 1  ;;  %v2355_v2 = vmov (!%p216_p9), 0.0   ;;  %v256_v3 = vld [vmem:[%s2812_s5] sm:$0x3] (!%p216_p9)  ;;  %v2132_v4 = vld [vmem:[%s2812_s5 + $0x4] sm:$0x3] (!%p216_p9) }
   0xe   : > { %219 = sbr.rel (%p216_p9) target bundleno = 971 (0x3cb), region = 44  ;;  %251 = vst [vmem:[#allocation2] sm:$0xf] (!%p216_p9), %v2355_v2  ;;  %252 = vst [vmem:[#allocation2 + $0xc] sm:$0xf] (!%p216_p9), %v2355_v2  ;;  %364 = vmatprep.mubr.f32.mxu0 (!%p216_p9), %v2355_v2  ;;  %1258 = vmatprep.mubr.f32.mxu1 (!%p216_p9), %v2355_v2  ;;  %s2356_s18 = smov (!%p216_p9), 111  }
   0xf   : > { %v259_v1 = vshrl.u32 (!%p216_p9), %v258_v0, 7  ;;  %s2357_s19 = smov (!%p216_p9), 127   ;;  %s2358_s20 = smov (!%p216_p9), 113   ;;  %vm270_vm0 = vcmask (!%p216_p9), 908288   ;;  %vm476_vm1 = vcmask (!%p216_p9), 924672   ;;  %vm579_vm2 = vcmask (!%p216_p9), 1039360  }
  0x10   : > { %s2359_s26 = smov (!%p216_p9), 16   ;;  %s2360_s28 = smov (!%p216_p9), 17   ;;  %vm288_vm3 = vcmask (!%p216_p9), 130048   ;;  %vm295_vm4 = vcmask (!%p216_p9), 1043456   ;;  %v2125_v36 = vld [vmem:[%s2808_s1 + $0x4] sm:$0xf] (!%p216_p9) }
  0x11   : > { %v2461_v5 = vsub.s32 (!%p216_p9), 0, %v259_v1  ;;  %v2463_v6 = vsub.s32 (!%p216_p9), 1, %v259_v1  ;;  %s2361_s29 = smov (!%p216_p9), 15   ;;  %vm291_vm5 = vcmask (!%p216_p9), 31744   ;;  %s2362_s11 = smov (!%p216_p9), 1   ;;  %v2364_v44 = vmov (!%p216_p9), 0  }
  0x12   : > { %s2363_s12 = smov (!%p216_p9), 112   ;;  %v1137_v42 = vld [vmem:[%s2809_s2] sm:$0xf] (!%p216_p9)  ;;  %2285 = vset.pattern.permute.xlu0 (!%p216_p9), %v2364_v44  ;;  %v2168_v47 = vld [vmem:[%s2812_s5 + $0x4] sm:$0x3] (!%p216_p9)  ;;  %vm380_vm6 = vcmask (!%p216_p9), 138240  }
  0x13   : > { %v261_v7 = vrot.slane (!%p216_p9), %v256_v3, %v2461_v5  ;;  %v265_v8 = vrot.slane (!%p216_p9), %v256_v3, %v2463_v6  ;;  %v467_v9 = vrot.slane (!%p216_p9), %v2132_v4, %v2461_v5  ;;  %v471_v10 = vrot.slane (!%p216_p9), %v2132_v4, %v2463_v6  ;;  %v1154_v43 = vld [vmem:[%s2812_s5] sm:$0x3] (!%p216_p9)  ;;  %v2133_v1 = vld [vmem:[%s2808_s1 + $0x8] sm:$0xf] (!%p216_p9) }
  0x14   : > { %v1159_v45 = vrot.slane (!%p216_p9), %v1154_v43, %v2461_v5  ;;  %v1163_v46 = vrot.slane (!%p216_p9), %v1154_v43, %v2463_v6  ;;  %v1359_v48 = vrot.slane (!%p216_p9), %v2168_v47, %v2461_v5  ;;  %v1363_v49 = vrot.slane (!%p216_p9), %v2168_v47, %v2463_v6  ;;  %v276_v57 = vld [vmem:[%s2808_s1] sm:$0xf] (!%p216_p9) }
  0x15   : > { %s246_s13 = scalar_select %p245_p10, %s2422_s25, 1  ;;  %v2474_v12 = vcombine.low %v261_v7, %v265_v8  ;;  %v2479_v13 = vcombine.low %v467_v9, %v471_v10  ;;  %vm493_vm7 = vcmask 121856   ;;  %vm596_vm8 = vcmask 7168   ;;  %v2137_v9 = vld [vmem:[%s2808_s1 + $0xc] sm:$0xf] }
  0x16   : > { %v2547_v50 = vcombine.low %v1159_v45, %v1163_v46  ;;  %v2551_v51 = vcombine.low %v1359_v48, %v1363_v49  ;;  %vm960_vm9 = vcmask 916480  }
  0x17   : > { %s2202_s14 = sshll.u32 %s246_s13, 3  ;;  %267 = vrot.lane.b32.xlu0 %v2474_v12, %s2356_s18  ;;  %576 = vrot.lane.b32.xlu1 %v2474_v12, %s2357_s19 }
  0x18   : > { %s249_s17 = scalar_lea.vmem %s2807_s0, %s2202_s14 }
  0x19   : > { %v2472_v11 = vld [vmem:[%s249_s17] sm:$0xff] }
  0x1a   : > { %253 = vst [vmem:[#allocation2 + $0x4] sm:$0xff] %v2472_v11 }
  0x1b   : > { %473 = vrot.lane.b32.xlu0 %v2479_v13, %s2358_s20 }
  0x21   : > { %v254_v14 = vld [vmem:[#allocation2] sm:$0xff]  ;;  %v2485_v15 = vld [vmem:[#allocation2 + $0x8] sm:$0xff] }
  0x22   : > { %v2487_v16 = vcombine.high %v254_v14, %v254_v14  ;;  %286 = vrot.lane.b32.xlu0 %v2485_v15, %s2359_s26  ;;  %v953_v41 = vcombine.high %v2485_v15, %v2485_v15 }
  0x24   : > { %284 = vrot.lane.b32.xlu1 %v2487_v16, %s2359_s26 }
  0x28   : > { %282 = vrot.lane.b32.xlu1 %v254_v14, %s2359_s26 }
  0x89   : > { %v268_v17 = vpop.permute.xlu0 %267  ;;  %v577_v19 = vpop.permute.xlu1 %576 }
  0x8a   : > { %v269_v18 = vrot.slane %v268_v17, 4  ;;  %v578_v25 = vrot.slane %v577_v19, 4 }
  0x8c   : > { %v271_v20 = vsel %vm270_vm0, %v269_v18, %v268_v17  ;;  %v275_v21 = vmul.f32 %v269_v18, %v2485_v15  ;;  %v580_v31 = vsel %vm579_vm2, %v578_v25, %v577_v19  ;;  %v584_v39 = vmul.f32 %v578_v25, %v2485_v15 }
  0x8d   : > { %v274_v22 = vmul.f32 %v271_v20, %v254_v14  ;;  %v474_v23 = vpop.permute.xlu0 %473  ;;  %v583_v34 = vmul.f32 %v580_v31, %v254_v14 }
  0x8e   : > { %v475_v24 = vrot.slane %v474_v23, 4  ;;  %378 = vrot.lane.b32.xlu1 %v275_v21, %s2360_s28 }
  0x8f   : > { %v373_v26 = vcombine.high %v274_v22, %v274_v22  ;;  %v589_v40 = vcombine.high %v583_v34, %v583_v34 }
  0x90   : > { %v477_v27 = vsel %vm476_vm1, %v475_v24, %v474_v23  ;;  %v481_v38 = vmul.f32 %v475_v24, %v2485_v15 }
  0x91   : > { %v480_v28 = vmul.f32 %v477_v27, %v254_v14  ;;  %376 = vrot.lane.b32.xlu0 %v373_v26, %s2360_s28  ;;  %v2141_v26 = vld [vmem:[%s2808_s1 + $0x10] sm:$0xf] }
  0x93   : > { %v486_v33 = vcombine.high %v480_v28, %v480_v28 }
  0x94   : > { %v287_v30 = vpop.permute.xlu0 %286 }
  0x95   : > { %489 = vrot.lane.b32.xlu1 %v486_v33, %s2361_s29  ;;  %374 = vrot.lane.b32.xlu0 %v274_v22, %s2360_s28 }
  0x96   : > { %v285_v29 = vpop.permute.xlu1 %284 }
  0x97   : > { %v290_v32 = vsel %vm288_vm3, %v285_v29, %v287_v30 }
  0x98   : > { %2126 = vmatprep.subr.msk.mxu0 %vm295_vm4, %v290_v32 }
  0x99   : > { %487 = vrot.lane.b32.xlu1 %v480_v28, %s2361_s29  ;;  %491 = vrot.lane.b32.xlu0 %v481_v38, %s2361_s29  ;;  %v2149_v38 = vld [vmem:[%s2808_s1 + $0x18] sm:$0xf] }
  0x9a   : > { %v283_v35 = vpop.permute.xlu1 %282 }
  0x9b   : > { %v289_v37 = vsel %vm288_vm3, %v283_v35, %v285_v29 }
  0x9c   : > { %2127 = vmatpush1.msk.msra.mxu0 %vm295_vm4, %v289_v37 }
  0x9d   : > { %2128 = vmatmul.mubr.msk.f32.vlgmr.msra.gmra.mrb[0].mxu0 %vm291_vm5, %v2125_v36  ;;  %592 = vrot.lane.b32.xlu0 %v589_v40, %s2362_s11 }
  0x9e   : > { %454 = vmatprep.mubr.f32.mxu0 %v2355_v2  ;;  %594 = vrot.lane.b32.xlu1 %v584_v39, %s2362_s11 }
  0xa1   : > { %590 = vrot.lane.b32.xlu0 %v583_v34, %s2362_s11 }
  0xa2   : > { %761 = vrot.lane.b32.xlu1 %v254_v14, %s2357_s19 }
  0xa5   : > { %763 = vrot.lane.b32.xlu0 %v2485_v15, %s2357_s19 }
  0xa6   : > { %856 = vrot.lane.b32.xlu1 %v254_v14, %s2358_s20 }
  0xa9   : > { %858 = vrot.lane.b32.xlu0 %v2485_v15, %s2358_s20 }
  0xaa   : > { %956 = vrot.lane.b32.xlu1 %v2485_v15, %s2363_s12 }
  0xad   : > { %958 = vrot.lane.b32.xlu0 %v953_v41, %s2363_s12  ;;  %v2153_v41 = vld [vmem:[%s2808_s1 + $0x1c] sm:$0xf] }
  0xae   : > { %954 = vrot.lane.b32.xlu1 %v2487_v16, %s2363_s12 }
  0xb1   : > { %1043 = vrot.lane.b32.xlu0 %v254_v14, %s2356_s18 }
  0xb2   : > { %1045 = vrot.lane.b32.xlu1 %v2485_v15, %s2356_s18 }
  0xb5   : > { %1140 = vperm.xlu0 %2285, %v1137_v42  }
  0xb6   : > { %1165 = vrot.lane.b32.xlu1 %v2547_v50, %s2356_s18 }
  0xb9   : > { %1466 = vrot.lane.b32.xlu0 %v2547_v50, %s2357_s19 }
  0xba   : > { %1365 = vrot.lane.b32.xlu1 %v2551_v51, %s2358_s20 }
 0x100   : > { %v379_v52 = vpop.permute.xlu1 %378 }
 0x103   : > { %v377_v53 = vpop.permute.xlu0 %376 }
 0x104   : > { %v382_v54 = vsel %vm380_vm6, %v377_v53, %v379_v52 }
 0x105   : > { %2129 = vmatprep.subr.msk.mxu0 %vm295_vm4, %v382_v54 }
 0x107   : > { %v490_v55 = vpop.permute.xlu1 %489  ;;  %v375_v56 = vpop.permute.xlu0 %374 }
 0x108   : > { %v381_v58 = vsel %vm380_vm6, %v375_v56, %v377_v53 }
 0x109   : > { %2130 = vmatpush1.msk.msra.mxu0 %vm295_vm4, %v381_v58 }
 0x10a   : > { %2131 = vmatmul.mubr.msk.f32.vlgmr.msra.gmra.mrb[0].mxu0 %vm291_vm5, %v276_v57 }
 0x10b   : > { %v488_v59 = vpop.permute.xlu1 %487  ;;  %v492_v60 = vpop.permute.xlu0 %491  ;;  %567 = vmatprep.mubr.f32.mxu0 %v2355_v2 }
 0x10c   : > { %v494_v61 = vsel %vm493_vm7, %v488_v59, %v490_v55  ;;  %v495_v62 = vsel %vm493_vm7, %v490_v55, %v492_v60 }
 0x10d   : > { %2134 = vmatprep.subr.msk.mxu0 %vm295_vm4, %v495_v62 }
 0x10e   : > { %2135 = vmatpush1.msk.msra.mxu0 %vm295_vm4, %v494_v61 }
 0x10f   : > { %v593_v63 = vpop.permute.xlu0 %592 }
 0x110   : > { %v595_v0 = vpop.permute.xlu1 %594 }
 0x111   : > { %v598_v3 = vsel %vm596_vm8, %v593_v63, %v595_v0 }
 0x112   : > { %2138 = vmatprep.subr.msk.mxu0 %vm295_vm4, %v598_v3  ;;  %2136 = vmatmul.mubr.msk.f32.vlgmr.msra.gmra.mrb[0].mxu0 %vm291_vm5, %v2133_v1 }
 0x113   : > { %v591_v4 = vpop.permute.xlu0 %590  ;;  %670 = vmatprep.mubr.f32.mxu0 %v2355_v2 }
 0x114   : > { %v762_v5 = vpop.permute.xlu1 %761  ;;  %v597_v6 = vsel %vm596_vm8, %v591_v4, %v593_v63 }
 0x115   : > { %2139 = vmatpush1.msk.msra.mxu0 %vm295_vm4, %v597_v6  ;;  %v765_v7 = vrot.slane %v762_v5, 4 }
 0x116   : > { %2142 = vmatprep.subr.msk.mxu0 %vm295_vm4, %v2485_v15 }
 0x117   : > { %v764_v8 = vpop.permute.xlu0 %763 }
 0x118   : > { %v857_v10 = vpop.permute.xlu1 %856  ;;  %v766_v14 = vrot.slane %v764_v8, 4 }
 0x119   : > { %v860_v18 = vrot.slane %v857_v10, 4 }
 0x11a   : > { %v767_v17 = vsel %vm295_vm4, %v765_v7, %v766_v14  ;;  %2140 = vmatmul.mubr.msk.f32.vlgmr.msra.gmra.mrb[0].mxu0 %vm291_vm5, %v2137_v9  ;;  %v2024_v14 = vld [vmem:[%s2811_s4] sm:$0xf] }
 0x11b   : > { %v768_v19 = vsel %vm579_vm2, %v767_v17, %v764_v8  ;;  %2143 = vmatpush1.msk.msra.mxu0 %vm295_vm4, %v2487_v16  ;;  %752 = vmatprep.mubr.f32.mxu0 %v2355_v2  ;;  %v859_v15 = vpop.permute.xlu0 %858 }
 0x11c   : > { %v957_v20 = vpop.permute.xlu1 %956  ;;  %v771_v21 = vmul.f32 %v768_v19, %v2479_v13  ;;  %v861_v22 = vrot.slane %v859_v15, 4 }
 0x11e   : > { %v775_v23 = vcombine.high %v771_v21, %v771_v21  ;;  %v862_v24 = vsel %vm295_vm4, %v860_v18, %v861_v22 }
 0x11f   : > { %v863_v25 = vsel %vm476_vm1, %v862_v24, %v859_v15  ;;  %v959_v28 = vpop.permute.xlu0 %958 }
 0x120   : > { %v955_v27 = vpop.permute.xlu1 %954  ;;  %v866_v16 = vmul.f32 %v863_v25, %v2474_v12  ;;  %2146 = vmatprep.subr.msk.mxu0 %vm295_vm4, %v775_v23  ;;  %v2145_v12 = vld [vmem:[%s2808_s1 + $0x14] sm:$0xf]  ;;  %v962_v35 = vsel %vm960_vm9, %v957_v20, %v959_v28 }
 0x121   : > { %v961_v39 = vsel %vm960_vm9, %v955_v27, %v957_v20 }
 0x122   : > { %v870_v29 = vcombine.high %v866_v16, %v866_v16  ;;  %2144 = vmatmul.mubr.msk.f32.vlgmr.msra.gmra.mrb[0].mxu0 %vm291_vm5, %v2141_v26 }
 0x123   : > { %2147 = vmatpush1.msk.msra.mxu0 %vm295_vm4, %v771_v21  ;;  %847 = vmatprep.mubr.f32.mxu0 %v2355_v2  ;;  %v1044_v31 = vpop.permute.xlu0 %1043  ;;  %v2161_v21 = vld [vmem:[%s2810_s3 + $0x4] sm:$0xf] }
 0x124   : > { %v1046_v30 = vpop.permute.xlu1 %1045  ;;  %2150 = vmatprep.subr.msk.mxu0 %vm295_vm4, %v870_v29  ;;  %v1047_v33 = vrot.slane %v1044_v31, 4 }
 0x125   : > { %v1048_v32 = vrot.slane %v1046_v30, 4 }
 0x127   : > { %v1049_v34 = vsel %vm295_vm4, %v1047_v33, %v1048_v32 }
 0x128   : > { %v1050_v36 = vsel %vm270_vm0, %v1049_v34, %v1046_v30  ;;  %v1166_v52 = vpop.permute.xlu1 %1165 }
 0x129   : > { %v1052_v37 = vmul.f32 %v1050_v36, %v2479_v13  ;;  %v2157_v13 = vld [vmem:[%s2808_s1 + $0x20] sm:$0xf]  ;;  %v1167_v53 = vrot.slane %v1166_v52, 4 }
 0x12a   : > { %2148 = vmatmul.mubr.msk.f32.vlgmr.msra.gmra.mrb[0].mxu0 %vm291_vm5, %v2145_v12  ;;  %v2169_v12 = vld [vmem:[%s2810_s3 + $0x8] sm:$0xf] }
 0x12b   : > { %2151 = vmatpush1.msk.msra.mxu0 %vm295_vm4, %v866_v16  ;;  %942 = vmatprep.mubr.f32.mxu0 %v2355_v2  ;;  %v1056_v40 = vcombine.high %v1052_v37, %v1052_v37  ;;  %v1168_v54 = vsel %vm270_vm0, %v1167_v53, %v1166_v52  ;;  %v1173_v16 = vld [vmem:[%s2810_s3] sm:$0xf] }
 0x12c   : > { %2154 = vmatprep.subr.msk.mxu0 %vm295_vm4, %v962_v35  ;;  %v1366_v57 = vpop.permute.xlu1 %1365 }
 0x12d   : > { %v1367_v61 = vrot.slane %v1366_v57, 4 }
 0x12f   : > { %v1368_v0 = vsel %vm476_vm1, %v1367_v61, %v1366_v57  ;;  %v2177_v57 = vld [vmem:[%s2810_s3 + $0x10] sm:$0xf] }
 0x132   : > { %2152 = vmatmul.mubr.msk.f32.vlgmr.msra.gmra.mrb[0].mxu0 %vm291_vm5, %v2149_v38 }
 0x133   : > { %2155 = vmatpush1.msk.msra.mxu0 %vm295_vm4, %v961_v39  ;;  %1034 = vmatprep.mubr.f32.mxu0 %v2355_v2 }
 0x134   : > { %2158 = vmatprep.subr.msk.mxu0 %vm295_vm4, %v1056_v40  ;;  %v1141_v42 = vpop.permute.xlu0 %1140 }
 0x138   : > { %v1467_v59 = vpop.permute.xlu0 %1466 }
 0x139   : > { %v1468_v63 = vrot.slane %v1467_v59, 4 }
 0x13a   : > { %2156 = vmatmul.mubr.msk.f32.vlgmr.msra.gmra.mrb[0].mxu0 %vm291_vm5, %v2153_v41 }
 0x13b   : > { %2159 = vmatpush1.msk.msra.mxu0 %vm295_vm4, %v1052_v37  ;;  %1128 = vmatprep.mubr.f32.mxu0 %v2355_v2  ;;  %v1469_v1 = vsel %vm579_vm2, %v1468_v63, %v1467_v59 }
 0x142   : > { %2160 = vmatmul.mubr.msk.f32.vlgmr.msra.gmra.mrb[0].mxu0 %vm291_vm5, %v2157_v13 }
 0x215   : > { %v1130_v43 = vpop.f32.mrb[0].mxu0 }
 0x216   : > { %v1143_v44 = vadd.f32 %v1141_v42, %v1130_v43  ;;  %v1132_v45 = vpop.f32.mrb[1].mxu0 }
 0x217   : > { %v1144_v46 = vadd.f32 %v1141_v42, %v1132_v45 }
 0x218   : > { %v1145_v47 = vmax.f32 %v1143_v44, 0.0  ;;  %v2173_v44 = vld [vmem:[%s2810_s3 + $0xc] sm:$0xf] }
 0x219   : > { %v1146_v48 = vmax.f32 %v1144_v46, 0.0 }
 0x21b   : > { %v1149_v49 = vcombine.low %v1145_v47, %v1146_v48 }
 0x21d   : > { %1151 = vst [vmem:[#allocation2 + $0x4] sm:$0xff] %v1149_v49 }
 0x224   : > { %v1152_v55 = vld [vmem:[#allocation2] sm:$0xff]  ;;  %v2632_v56 = vld [vmem:[#allocation2 + $0x8] sm:$0xff] }
 0x225   : > { %v1171_v58 = vmul.f32 %v1168_v54, %v1152_v55  ;;  %1183 = vrot.lane.b32.xlu0 %v2632_v56, %s2359_s26  ;;  %v2636_v60 = vcombine.high %v1152_v55, %v1152_v55  ;;  %v1172_v3 = vmul.f32 %v1167_v53, %v2632_v56  ;;  %v1371_v4 = vmul.f32 %v1368_v0, %v1152_v55 }
 0x226   : > { %v1372_v5 = vmul.f32 %v1367_v61, %v2632_v56  ;;  %v1472_v6 = vmul.f32 %v1469_v1, %v1152_v55  ;;  %v1473_v9 = vmul.f32 %v1468_v63, %v2632_v56  ;;  %v1841_v10 = vcombine.high %v2632_v56, %v2632_v56 }
 0x227   : > { %v1267_v62 = vcombine.high %v1171_v58, %v1171_v58  ;;  %1181 = vrot.lane.b32.xlu1 %v2636_v60, %s2359_s26  ;;  %v1377_v7 = vcombine.high %v1371_v4, %v1371_v4 }
 0x228   : > { %v1478_v8 = vcombine.high %v1472_v6, %v1472_v6 }
 0x229   : > { %1270 = vrot.lane.b32.xlu0 %v1267_v62, %s2360_s28 }
 0x22b   : > { %1179 = vrot.lane.b32.xlu1 %v1152_v55, %s2359_s26 }
 0x22d   : > { %1268 = vrot.lane.b32.xlu0 %v1171_v58, %s2360_s28 }
 0x22f   : > { %1272 = vrot.lane.b32.xlu1 %v1172_v3, %s2360_s28 }
 0x231   : > { %1382 = vrot.lane.b32.xlu0 %v1372_v5, %s2361_s29 }
 0x233   : > { %1380 = vrot.lane.b32.xlu1 %v1377_v7, %s2361_s29  ;;  %v2189_v7 = vld [vmem:[%s2810_s3 + $0x1c] sm:$0xf] }
 0x235   : > { %1481 = vrot.lane.b32.xlu0 %v1478_v8, %s2362_s11 }
 0x237   : > { %1378 = vrot.lane.b32.xlu1 %v1371_v4, %s2361_s29  ;;  %v2185_v4 = vld [vmem:[%s2810_s3 + $0x18] sm:$0xf]  ;;  %s242_s29 = sand.u32 1, %s2345_s22  }
 0x238   : > { %s2045_s10 = scalar_lea.sflag [#allocation4], %s242_s29 }
 0x239   : > { %1479 = vrot.lane.b32.xlu0 %v1472_v6, %s2362_s11 }
 0x23b   : > { %1483 = vrot.lane.b32.xlu1 %v1473_v9, %s2362_s11  ;;  %s2122_s11 = sshll.u32 %s242_s29, 3 }
 0x23c   : > { %s244_s14 = scalar_lea.vmem [#allocation3], %s2122_s11 }
 0x23d   : > { %1651 = vrot.lane.b32.xlu0 %v2632_v56, %s2357_s19  ;;  %s2059_s15 = sshll.u32 %s244_s14, 4  ;;  %s2767_s15 = int_to_ptr.vmem [resolvable:$true] %s2059_s15 }
 0x23e   : > { %s2291_s13 = scalar_lea.vmem %s2767_s15, 128 }
 0x23f   : > { %1649 = vrot.lane.b32.xlu1 %v1152_v55, %s2357_s19  ;;  %p2292_p11 = scmp.ne.s32.totalorder %s2767_s15, %s2291_s13 }
 0x241   : > { %1746 = vrot.lane.b32.xlu0 %v2632_v56, %s2358_s20  ;;  %p2293_p12 = pnand %p2292_p11, %p2439_p5 }
 0x243   : > { %1744 = vrot.lane.b32.xlu1 %v1152_v55, %s2358_s20  ;;  %p2294_p13 = pneg %p2293_p12 }
 0x245   : > { %1846 = vrot.lane.b32.xlu0 %v1841_v10, %s2363_s12  ;;  %v2033_v10 = vcombine.high %v2472_v11, %v2472_v11 }
 0x247   : > { %1844 = vrot.lane.b32.xlu1 %v2632_v56, %s2363_s12 }
 0x249   : > { %1930 = vrot.lane.b32.xlu0 %v1152_v55, %s2356_s18 }
 0x24b   : > { %1842 = vrot.lane.b32.xlu1 %v2636_v60, %s2363_s12  ;;  %s2203_s12 = sshll.u32 %s2422_s25, 7  ;;  %s2365_s25 = smov [#allocation3]  }
 0x24c   : > { %s2765_s9 = scalar_lea.hbm %s2813_s6, %s2203_s12  ;;  %s2295_s26 = sshll.u32 %s2365_s25, 4  ;;  %s2296_s26 = int_to_ptr.vmem [resolvable:$false] %s2295_s26 }
 0x24d   : > { %2027 = vperm.xlu0 %2285, %v2024_v14   ;;  %s2297_s28 = scalar_lea.vmem %s2296_s26, 256  ;;  %p2298_p0 = scmp.lt.s32.totalorder %s2767_s15, %s2296_s26 }
 0x24e   : > { %p2299_p1 = scmp.lt.s32.totalorder %s2297_s28, %s2291_s13 }
 0x24f   : > { %1932 = vrot.lane.b32.xlu1 %v2632_v56, %s2356_s18 }
 0x250   : > { %p2300_p2 = por %p2299_p1, %p2298_p0 }
 0x252   : > { %p2301_p3 = pnand %p2300_p2, %p2294_p13 }
 0x297   : > { %v1184_v17 = vpop.permute.xlu0 %1183 }
 0x299   : > { %v1182_v18 = vpop.permute.xlu1 %1181 }
 0x29a   : > { %v1186_v19 = vsel %vm288_vm3, %v1182_v18, %v1184_v17 }
 0x29b   : > { %v1271_v15 = vpop.permute.xlu0 %1270  ;;  %2162 = vmatprep.subr.msk.mxu1 %vm295_vm4, %v1186_v19 }
 0x29d   : > { %v1180_v20 = vpop.permute.xlu1 %1179 }
 0x29e   : > { %v1185_v22 = vsel %vm288_vm3, %v1180_v20, %v1182_v18 }
 0x29f   : > { %v1269_v23 = vpop.permute.xlu0 %1268  ;;  %2163 = vmatpush1.msk.msra.mxu1 %vm295_vm4, %v1185_v22 }
 0x2a0   : > { %2164 = vmatmul.mubr.msk.f32.vlgmr.msra.gmra.mrb[0].mxu1 %vm291_vm5, %v2161_v21  ;;  %v1274_v27 = vsel %vm380_vm6, %v1269_v23, %v1271_v15 }
 0x2a1   : > { %v1273_v24 = vpop.permute.xlu1 %1272  ;;  %1347 = vmatprep.mubr.f32.mxu1 %v2355_v2 }
 0x2a2   : > { %v1275_v25 = vsel %vm380_vm6, %v1271_v15, %v1273_v24 }
 0x2a3   : > { %v1383_v26 = vpop.permute.xlu0 %1382  ;;  %2165 = vmatprep.subr.msk.mxu1 %vm295_vm4, %v1275_v25 }
 0x2a4   : > { %2166 = vmatpush1.msk.msra.mxu1 %vm295_vm4, %v1274_v27 }
 0x2a5   : > { %v1381_v28 = vpop.permute.xlu1 %1380 }
 0x2a6   : > { %v1385_v29 = vsel %vm493_vm7, %v1381_v28, %v1383_v26 }
 0x2a7   : > { %v1482_v30 = vpop.permute.xlu0 %1481  ;;  %2170 = vmatprep.subr.msk.mxu1 %vm295_vm4, %v1385_v29 }
 0x2a8   : > { %2167 = vmatmul.mubr.msk.f32.vlgmr.msra.gmra.mrb[0].mxu1 %vm291_vm5, %v1173_v16 }
 0x2a9   : > { %v1379_v31 = vpop.permute.xlu1 %1378  ;;  %1457 = vmatprep.mubr.f32.mxu1 %v2355_v2 }
 0x2aa   : > { %v1384_v32 = vsel %vm493_vm7, %v1379_v31, %v1381_v28 }
 0x2ab   : > { %v1480_v33 = vpop.permute.xlu0 %1479  ;;  %2171 = vmatpush1.msk.msra.mxu1 %vm295_vm4, %v1384_v32 }
 0x2ac   : > { %v1485_v37 = vsel %vm596_vm8, %v1480_v33, %v1482_v30 }
 0x2ad   : > { %v1484_v34 = vpop.permute.xlu1 %1483 }
 0x2ae   : > { %v1486_v35 = vsel %vm596_vm8, %v1482_v30, %v1484_v34 }
 0x2af   : > { %v1652_v36 = vpop.permute.xlu0 %1651  ;;  %2174 = vmatprep.subr.msk.mxu1 %vm295_vm4, %v1486_v35 }
 0x2b0   : > { %2172 = vmatmul.mubr.msk.f32.vlgmr.msra.gmra.mrb[0].mxu1 %vm291_vm5, %v2169_v12  ;;  %v1654_v39 = vrot.slane %v1652_v36, 4 }
 0x2b1   : > { %2175 = vmatpush1.msk.msra.mxu1 %vm295_vm4, %v1485_v37  ;;  %v1650_v38 = vpop.permute.xlu1 %1649  ;;  %1558 = vmatprep.mubr.f32.mxu1 %v2355_v2 }
 0x2b2   : > { %v1653_v40 = vrot.slane %v1650_v38, 4  ;;  %2178 = vmatprep.subr.msk.mxu1 %vm295_vm4, %v2632_v56 }
 0x2b3   : > { %v1747_v41 = vpop.permute.xlu0 %1746 }
 0x2b4   : > { %v1655_v13 = vsel %vm295_vm4, %v1653_v40, %v1654_v39  ;;  %v1749_v46 = vrot.slane %v1747_v41, 4 }
 0x2b5   : > { %v1656_v42 = vsel %vm579_vm2, %v1655_v13, %v1652_v36  ;;  %v1745_v43 = vpop.permute.xlu1 %1744 }
 0x2b6   : > { %v1659_v45 = vmul.f32 %v1656_v42, %v2551_v51  ;;  %v1748_v47 = vrot.slane %v1745_v43, 4 }
 0x2b7   : > { %v1847_v54 = vpop.permute.xlu0 %1846 }
 0x2b8   : > { %v1750_v48 = vsel %vm295_vm4, %v1748_v47, %v1749_v46  ;;  %2176 = vmatmul.mubr.msk.f32.vlgmr.msra.gmra.mrb[0].mxu1 %vm291_vm5, %v2173_v44  ;;  %v1663_v49 = vcombine.high %v1659_v45, %v1659_v45 }
 0x2b9   : > { %v1751_v52 = vsel %vm476_vm1, %v1750_v48, %v1747_v41  ;;  %2179 = vmatpush1.msk.msra.mxu1 %vm295_vm4, %v2636_v60  ;;  %v1845_v53 = vpop.permute.xlu1 %1844  ;;  %1640 = vmatprep.mubr.f32.mxu1 %v2355_v2 }
 0x2ba   : > { %2182 = vmatprep.subr.msk.mxu1 %vm295_vm4, %v1663_v49  ;;  %v1754_v55 = vmul.f32 %v1751_v52, %v2547_v50  ;;  %v2181_v50 = vld [vmem:[%s2810_s3 + $0x14] sm:$0xf]  ;;  %v1849_v0 = vsel %vm960_vm9, %v1845_v53, %v1847_v54 }
 0x2bb   : > { %v1931_v59 = vpop.permute.xlu0 %1930 }
 0x2bc   : > { %v1758_v58 = vcombine.high %v1754_v55, %v1754_v55  ;;  %v1934_v62 = vrot.slane %v1931_v59, 4 }
 0x2bd   : > { %v1843_v56 = vpop.permute.xlu1 %1842 }
 0x2be   : > { %v1848_v5 = vsel %vm960_vm9, %v1843_v56, %v1845_v53 }
 0x2c0   : > { %2180 = vmatmul.mubr.msk.f32.vlgmr.msra.gmra.mrb[0].mxu1 %vm291_vm5, %v2177_v57 }
 0x2c1   : > { %2183 = vmatpush1.msk.msra.mxu1 %vm295_vm4, %v1659_v45  ;;  %v1933_v60 = vpop.permute.xlu1 %1932  ;;  %1735 = vmatprep.mubr.f32.mxu1 %v2355_v2 }
 0x2c2   : > { %v1935_v61 = vrot.slane %v1933_v60, 4  ;;  %2186 = vmatprep.subr.msk.mxu1 %vm295_vm4, %v1758_v58 }
 0x2c4   : > { %v1936_v63 = vsel %vm295_vm4, %v1934_v62, %v1935_v61 }
 0x2c5   : > { %v1937_v1 = vsel %vm270_vm0, %v1936_v63, %v1933_v60 }
 0x2c6   : > { %v1939_v3 = vmul.f32 %v1937_v1, %v2551_v51  ;;  %v2193_v51 = vld [vmem:[%s2810_s3 + $0x20] sm:$0xf] }
 0x2c8   : > { %2184 = vmatmul.mubr.msk.f32.vlgmr.msra.gmra.mrb[0].mxu1 %vm291_vm5, %v2181_v50  ;;  %v1943_v6 = vcombine.high %v1939_v3, %v1939_v3 }
 0x2c9   : > { %2187 = vmatpush1.msk.msra.mxu1 %vm295_vm4, %v1754_v55  ;;  %1830 = vmatprep.mubr.f32.mxu1 %v2355_v2 }
 0x2ca   : > { %2190 = vmatprep.subr.msk.mxu1 %vm295_vm4, %v1849_v0 }
 0x2cc   : > { %v2028_v8 = vpop.permute.xlu0 %2027 }
 0x2d0   : > { %2188 = vmatmul.mubr.msk.f32.vlgmr.msra.gmra.mrb[0].mxu1 %vm291_vm5, %v2185_v4 }
 0x2d1   : > { %2191 = vmatpush1.msk.msra.mxu1 %vm295_vm4, %v1848_v5  ;;  %1921 = vmatprep.mubr.f32.mxu1 %v2355_v2 }
 0x2d2   : > { %2194 = vmatprep.subr.msk.mxu1 %vm295_vm4, %v1943_v6 }
 0x2d8   : > { %2192 = vmatmul.mubr.msk.f32.vlgmr.msra.gmra.mrb[0].mxu1 %vm291_vm5, %v2189_v7 }
 0x2d9   : > { %2195 = vmatpush1.msk.msra.mxu1 %vm295_vm4, %v1939_v3  ;;  %2015 = vmatprep.mubr.f32.mxu1 %v2355_v2 }
 0x2e0   : > { %2196 = vmatmul.mubr.msk.f32.vlgmr.msra.gmra.mrb[0].mxu1 %vm291_vm5, %v2193_v51 }
 0x3b3   : > { %v2017_v9 = vpop.f32.mrb[0].mxu1 }
 0x3b4   : > { %v2030_v14 = vadd.f32 %v2028_v8, %v2017_v9  ;;  %v2019_v17 = vpop.f32.mrb[1].mxu1 }
 0x3b5   : > { %v2031_v18 = vadd.f32 %v2028_v8, %v2019_v17 }
 0x3b6   : > { %v2035_v19 = vadd.f32 %v2030_v14, %v2472_v11 }
 0x3b7   : > { %v2036_v2 = vadd.f32 %v2033_v10, %v2031_v18 }
 0x3b8   : > { %v2037_v15 = vmax.f32 %v2035_v19, 0.0 }
 0x3b9   : > { %v2038_v20 = vmax.f32 %v2036_v2, 0.0 }
 0x3bb   : > { %v2041_v21 = vcombine.low %v2037_v15, %v2038_v20 }
 0x3bd   : > { %2043 = vst [vmem:[%s244_s14] sm:$0xff] %v2041_v21 }
 0x3be   : > { %2304 = shalt.err (!%p2301_p3)
}
 0x3bf   : > { %s2305_s19 = scalar_lea.hbm %s2765_s9, 128  ;;  %s2309_s29 = scalar_lea.hbm %s2813_s6, 256 }
 0x3c0   : > { %p2306_p4 = scmp.ne.s32.totalorder %s2765_s9, %s2305_s19  ;;  %p2310_p9 = scmp.lt.u32.totalorder %s2765_s9, %s2813_s6 }
 0x3c1   : > { %p2311_p10 = scmp.lt.u32.totalorder %s2309_s29, %s2305_s19  ;;  %p2313_p12 = scmp.lt.u32.totalorder %s2305_s19, %s2765_s9 }
 0x3c2   : > { %p2307_p7 = pnand %p2306_p4, %p2439_p5 }
 0x3c3   : > { %p2312_p11 = por %p2311_p10, %p2310_p9 }
 0x3c4   : > { %p2308_p8 = pneg %p2307_p7 }
 0x3c5   : > { %p2314_p13 = por %p2313_p12, %p2312_p11 }
 0x3c7   : > { %p2315_p0 = pnand %p2314_p13, %p2308_p8 }
 0x3c9   : > { %2318 = shalt.err (!%p2315_p0)
}
 0x3ca   : > { %2236 = dma.vmem_to_hbm [thread:$0]  (%p2439_p5), %s2767_s15, 128, %s2765_s9, %s2045_s10  }
 0x3cb PF: > { %p2242_p1 = scmp.ge.s32.totalorder %s2353_s24, 2  ;;  %s2071_s14 = sand.u32 1, %s2341_s21  }
 0x3cc   : > { %s2072_s16 = scalar_lea.sflag [#allocation4], %s2071_s14 }
 0x3cd   : > { %p2239_p2 = pnand %p2242_p1, %p2443_p6 }
 0x3cf   : > { %2336 = dma.done.wait (!%p2239_p2), %s2072_s16, 128  }
 0x3d0   : > { %2338 = vsyncadd (!%p2239_p2), %s2072_s16, 4294967168  ;;  %p16_p3 = scmp.ge.s32.totalorder %s2426_s27, 4   ;;  %s2816_s21 = smov %s2345_s22 }
 0x3d1   : > { %s2817_s22 = smov %s2349_s23  ;;  %s2818_s23 = smov %s2437_s30 }
 0x3d2   : > { %s2819_s24 = smov %s2426_s27  ;;  %18 = sbr.rel (!%p16_p3) target bundleno = 3 (0x3), region = 96 }
 0x3d9   :  { %2077 = vsyncpa [#allocation4], 1 }
 0x3da   :  { %2079 = vsyncpa [#allocation4 + $0x1], 1 }

</bundles_post_ra>
